<compile_context>
chip_gen: v6e
topology: v6e:2x2x1
jax: 0.10.0
libtpu: 0.0.40
codegen_flags: <defaults>
</compile_context>

<pallas_src>
import functools

import numpy as np
import jax
import jax.numpy as jnp
from jax.experimental import pallas as pl
from jax.experimental.pallas import tpu as pltpu

EPS = 1e-5


# ---------------- Pallas kernels ----------------

def conv_stats_kernel(p_ref, w_ref, b_ref, y_ref, stats_ref):
    """p_ref: (tm, Kp) bf16, w_ref: (Kp, Cout) bf16, b_ref: (1, Cout) f32.

    y_ref: (tm, Cout) f32 conv+bias output tile.
    stats_ref: (2, Cout) f32 accumulator (row 0 = sum, row 1 = sum of squares),
    resident across the M grid axis.
    """
    i = pl.program_id(0)
    y = jnp.dot(p_ref[...], w_ref[...], preferred_element_type=jnp.float32)
    y = y + b_ref[...]
    y_ref[...] = y

    @pl.when(i == 0)
    def _():
        stats_ref[...] = jnp.zeros_like(stats_ref)

    s = jnp.sum(y, axis=0, keepdims=True)
    sq = jnp.sum(y * y, axis=0, keepdims=True)
    stats_ref[...] = stats_ref[...] + jnp.concatenate([s, sq], axis=0)


def bn_relu_pool_kernel(x_ref, scale_ref, shift_ref, o_ref, *, cout):
    """Fused BN-apply + ReLU + MaxPool(3, stride=2, pad=1) for one image.

    x_ref:  (PH, 2, PW, 2*C) f32 — conv activation with H-parity on dim 1 and
            W-parity folded into lanes ([:C] = even col, [C:] = odd col).
    o_ref:  (PH, PW, C) f32 pooled output.
    Zero padding at the borders is valid because values are post-ReLU (>= 0)
    and every pooling window contains at least one in-bounds element.
    """
    C = cout
    x = x_ref[...]
    scale = scale_ref[...].reshape(1, 1, 1, 2 * C)
    shift = shift_ref[...].reshape(1, 1, 1, 2 * C)
    y = jnp.maximum(x * scale + shift, 0.0)          # BN + ReLU, one pass

    e = y[:, 0, :, :]                                # rows 2*ph     (PH, PW, 2C)
    o = y[:, 1, :, :]                                # rows 2*ph + 1

    def row_max(t):
        # max over cols {2pw-1, 2pw, 2pw+1} for every pw, fully vectorized.
        te = t[..., :C]                              # col 2pw
        to = t[..., C:]                              # col 2pw + 1
        to_left = jnp.concatenate(                   # col 2pw - 1
            [jnp.zeros_like(to[:, :1, :]), to[:, :-1, :]], axis=1)
        return jnp.maximum(jnp.maximum(te, to), to_left)

    re = row_max(e)                                  # contributions of row 2ph
    ro = row_max(o)                                  # contributions of row 2ph+1
    ro_up = jnp.concatenate(                         # contributions of row 2ph-1
        [jnp.zeros_like(ro[:1]), ro[:-1]], axis=0)
    o_ref[...] = jnp.maximum(jnp.maximum(re, ro), ro_up)


# ---------------- host-side glue ----------------

def im2col(x, K=7, stride=2, pad=3):
    """x: (N, C, H, W) -> (N*OH*OW, C*K*K), feature order (c, ki, kj)."""
    N, C, H, W = x.shape
    xp = jnp.pad(x, ((0, 0), (0, 0), (pad, pad), (pad, pad)))
    OH = (H + 2 * pad - K) // stride + 1
    OW = (W + 2 * pad - K) // stride + 1
    cols = []
    for ki in range(K):
        for kj in range(K):
            cols.append(xp[:, :, ki:ki + stride * OH:stride,
                              kj:kj + stride * OW:stride])
    pt = jnp.stack(cols, axis=0).reshape(K, K, N, C, OH, OW)
    pt = pt.transpose(2, 4, 5, 3, 0, 1)              # (N, OH, OW, C, KI, KJ)
    return pt.reshape(N * OH * OW, C * K * K), OH, OW


def resnet_enc_mandatory(x, w, b, gamma, beta, *, block_m=None):
    """x: (N, Cin, H, W) NCHW f32 -> (N, 64, H//4, W//4) NCHW f32."""
    N, Cin, H, W = x.shape
    Cout = w.shape[0]
    assert H % 4 == 0 and W % 4 == 0, "kernel assumes even conv/pool output"

    # im2col in bf16 (halves the expanded-patch HBM traffic).
    patches, OH, OW = im2col(x.astype(jnp.bfloat16))
    M, Kdim = patches.shape
    Kp = ((Kdim + 127) // 128) * 128                 # lane-align contraction dim
    patches = jnp.pad(patches, ((0, 0), (0, Kp - Kdim)))
    wmat = jnp.pad(w.reshape(Cout, Kdim).T,
                   ((0, Kp - Kdim), (0, 0))).astype(jnp.bfloat16)

    if block_m is None:
        block_m = next((c for c in (1024, 512, 256, 128, 64, 32, 16, 8)
                        if M % c == 0), M)
    assert M % block_m == 0
    grid_m = M // block_m

    # ---- Kernel 1: tiled conv matmul + bias + BN-stat accumulation ----
    y, stats = pl.pallas_call(
        conv_stats_kernel,
        out_shape=(jax.ShapeDtypeStruct((M, Cout), jnp.float32),
                   jax.ShapeDtypeStruct((2, Cout), jnp.float32)),
        grid=(grid_m,),
        in_specs=[
            pl.BlockSpec((block_m, Kp), lambda i: (i, 0)),
            pl.BlockSpec((Kp, Cout), lambda i: (0, 0)),
            pl.BlockSpec((1, Cout), lambda i: (0, 0)),
        ],
        out_specs=(
            pl.BlockSpec((block_m, Cout), lambda i: (i, 0)),
            pl.BlockSpec((2, Cout), lambda i: (0, 0)),     # resident accumulator
        ),
        compiler_params=pltpu.CompilerParams(
            dimension_semantics=("arbitrary",),            # stats accumulate over M
            vmem_limit_bytes=32 * 1024 * 1024),
    )(patches, wmat, b.reshape(1, Cout).astype(jnp.float32))

    # ---- finalize BatchNorm (training-mode biased batch stats), tiny math ----
    mean = stats[0] / M
    var = jnp.maximum(stats[1] / M - mean * mean, 0.0)
    scale = gamma * jax.lax.rsqrt(var + EPS)
    shift = beta - mean * scale
    scale2 = jnp.tile(scale, 2).reshape(1, 2 * Cout).astype(jnp.float32)
    shift2 = jnp.tile(shift, 2).reshape(1, 2 * Cout).astype(jnp.float32)

    # ---- Kernel 2: fused BN + ReLU + maxpool on a lane-dense view ----
    PH, PW = OH // 2, OW // 2
    yv = y.reshape(N, PH, 2, PW, 2 * Cout)           # free reshape (row-major)

    out_nhwc = pl.pallas_call(
        functools.partial(bn_relu_pool_kernel, cout=Cout),
        out_shape=jax.ShapeDtypeStruct((N, PH, PW, Cout), jnp.float32),
        grid=(N,),
        in_specs=[
            pl.BlockSpec((None, PH, 2, PW, 2 * Cout),
                         lambda n: (n, 0, 0, 0, 0)),
            pl.BlockSpec((1, 2 * Cout), lambda n: (0, 0)),
            pl.BlockSpec((1, 2 * Cout), lambda n: (0, 0)),
        ],
        out_specs=pl.BlockSpec((None, PH, PW, Cout), lambda n: (n, 0, 0, 0)),
        compiler_params=pltpu.CompilerParams(
            dimension_semantics=("parallel",),
            vmem_limit_bytes=32 * 1024 * 1024),
    )(yv, scale2, shift2)

    return out_nhwc.transpose(0, 3, 1, 2)            # back to NCHW


# ---------------- pure-JAX reference ----------------

def reference(x, w, b, gamma, beta):
    y = jax.lax.conv_general_dilated(
        x, w, (2, 2), [(3, 3), (3, 3)],
        dimension_numbers=('NCHW', 'OIHW', 'NCHW'),
        precision=jax.lax.Precision.HIGHEST)
    y = y + b[None, :, None, None]
    mean = y.mean(axis=(0, 2, 3), keepdims=True)
    var = jnp.square(y - mean).mean(axis=(0, 2, 3), keepdims=True)
    y = (y - mean) * jax.lax.rsqrt(var + EPS) \
        * gamma[None, :, None, None] + beta[None, :, None, None]
    y = jnp.maximum(y, 0.0)
    return jax.lax.reduce_window(
        y, -jnp.inf, jax.lax.max,
        window_dimensions=(1, 1, 3, 3), window_strides=(1, 1, 2, 2),
        padding=[(0, 0), (0, 0), (1, 1), (1, 1)])


if __name__ == "__main__":
    key = jax.random.PRNGKey(0)
    k1, k2, k3, k4, k5 = jax.random.split(key, 5)

    N, Cin, H, W = 2, 3, 16, 16
    Cout = 64

    x = jax.random.normal(k1, (N, Cin, H, W), jnp.float32)
    w = jax.random.normal(k2, (Cout, Cin, 7, 7), jnp.float32) * 0.1
    b = jax.random.normal(k3, (Cout,), jnp.float32) * 0.1
    gamma = 1.0 + 0.1 * jax.random.normal(k4, (Cout,), jnp.float32)
    beta = 0.1 * jax.random.normal(k5, (Cout,), jnp.float32)

    # block_m=64 -> 2 grid steps, exercising the cross-tile BN accumulation.
    out = jax.block_until_ready(
        resnet_enc_mandatory(x, w, b, gamma, beta, block_m=64))
    ref = jax.block_until_ready(reference(x, w, b, gamma, beta))

    assert out.shape == (N, Cout, 4, 4), out.shape
    # Tolerance loosened vs the f32-HIGHEST reference because the conv matmul
    # runs natively in bf16 on the MXU (f32 accumulation).
    np.testing.assert_allclose(np.asarray(out), np.asarray(ref),
                               rtol=3e-2, atol=3e-2)
    print("KERNEL_OK")
</pallas_src>

<mosaic_0001>
module attributes {stable_mosaic.version = 11 : i64} {
  func.func @conv_stats_kernel(%arg0: i32, %arg1: memref<64x256xbf16, #tpu.memory_space<vmem>>, %arg2: memref<256x64xbf16, #tpu.memory_space<vmem>>, %arg3: memref<1x64xf32, #tpu.memory_space<vmem>>, %arg4: memref<64x64xf32, #tpu.memory_space<vmem>>, %arg5: memref<2x64xf32, #tpu.memory_space<vmem>>) attributes {dimension_semantics = [#tpu.dimension_semantics<arbitrary>], iteration_bounds = array<i64: 2>, scalar_prefetch = 0 : i64, scratch_operands = 0 : i64, tpu.core_type = #tpu.core_type<tc>, window_params = [{transform_indices = @transform_0, window_bounds = array<i64: 64, 256>}, {pipeline_mode = #tpu.pipeline_mode<synchronous>, transform_indices = @transform_1, window_bounds = array<i64: 256, 64>}, {pipeline_mode = #tpu.pipeline_mode<synchronous>, transform_indices = @transform_2, window_bounds = array<i64: 1, 64>}, {transform_indices = @transform_3, window_bounds = array<i64: 64, 64>}, {pipeline_mode = #tpu.pipeline_mode<synchronous>, transform_indices = @transform_4, window_bounds = array<i64: 2, 64>}]} {
    %c0 = arith.constant 0 : index
    %c0_0 = arith.constant 0 : index
    %0 = vector.load %arg1[%c0, %c0_0] : memref<64x256xbf16, #tpu.memory_space<vmem>>, vector<64x256xbf16>
    %c0_1 = arith.constant 0 : index
    %c0_2 = arith.constant 0 : index
    %1 = vector.load %arg2[%c0_1, %c0_2] : memref<256x64xbf16, #tpu.memory_space<vmem>>, vector<256x64xbf16>
    %cst = arith.constant dense<0.000000e+00> : vector<64x64xf32>
    %2 = tpu.matmul %0, %1, %cst {dimension_numbers = #tpu.dot_dimension_numbers<[1], [0], [0], [1], [0, 0, 1, 1], [], []>} : vector<64x256xbf16>, vector<256x64xbf16>, vector<64x64xf32> -> vector<64x64xf32>
    %c0_3 = arith.constant 0 : index
    %c0_4 = arith.constant 0 : index
    %3 = vector.load %arg3[%c0_3, %c0_4] : memref<1x64xf32, #tpu.memory_space<vmem>>, vector<1x64xf32>
    %4 = vector.broadcast %3 : vector<1x64xf32> to vector<64x64xf32>
    %5 = arith.addf %2, %4 : vector<64x64xf32>
    %c0_5 = arith.constant 0 : index
    %c0_6 = arith.constant 0 : index
    %6 = vector.load %arg4[%c0_5, %c0_6] : memref<64x64xf32, #tpu.memory_space<vmem>>, vector<64x64xf32>
    tpu.vector_store %arg4[%c0_5, %c0_6], %5 {strides = array<i32>} : memref<64x64xf32, #tpu.memory_space<vmem>>, vector<64x64xf32>,
    %c0_i32 = arith.constant 0 : i32
    %7 = arith.cmpi eq, %arg0, %c0_i32 : i32
    %8 = arith.extui %7 : i1 to i32
    %c0_i32_7 = arith.constant 0 : i32
    %9 = arith.cmpi ne, %8, %c0_i32_7 : i32
    scf.if %9 {
      %cst_14 = arith.constant 0.000000e+00 : f32
      %19 = vector.broadcast %cst_14 : f32 to vector<2x64xf32>
      %c0_15 = arith.constant 0 : index
      %c0_16 = arith.constant 0 : index
      %20 = vector.load %arg5[%c0_15, %c0_16] : memref<2x64xf32, #tpu.memory_space<vmem>>, vector<2x64xf32>
      tpu.vector_store %arg5[%c0_15, %c0_16], %19 {strides = array<i32>} : memref<2x64xf32, #tpu.memory_space<vmem>>, vector<2x64xf32>,
    } else {
    }
    %cst_8 = arith.constant dense<0.000000e+00> : vector<64xf32>
    %10 = vector.multi_reduction <add>, %5, %cst_8 [0] : vector<64x64xf32> to vector<64xf32>
    %11 = vector.shape_cast %10 : vector<64xf32> to vector<1x64xf32>
    %12 = arith.mulf %5, %5 : vector<64x64xf32>
    %cst_9 = arith.constant dense<0.000000e+00> : vector<64xf32>
    %13 = vector.multi_reduction <add>, %12, %cst_9 [0] : vector<64x64xf32> to vector<64xf32>
    %14 = vector.shape_cast %13 : vector<64xf32> to vector<1x64xf32>
    %c0_10 = arith.constant 0 : index
    %c0_11 = arith.constant 0 : index
    %15 = vector.load %arg5[%c0_10, %c0_11] : memref<2x64xf32, #tpu.memory_space<vmem>>, vector<2x64xf32>
    %16 = tpu.concatenate %11, %14 in 0 : vector<1x64xf32>, vector<1x64xf32> -> vector<2x64xf32>
    %17 = arith.addf %15, %16 : vector<2x64xf32>
    %c0_12 = arith.constant 0 : index
    %c0_13 = arith.constant 0 : index
    %18 = vector.load %arg5[%c0_12, %c0_13] : memref<2x64xf32, #tpu.memory_space<vmem>>, vector<2x64xf32>
    tpu.vector_store %arg5[%c0_12, %c0_13], %17 {strides = array<i32>} : memref<2x64xf32, #tpu.memory_space<vmem>>, vector<2x64xf32>,
    return
  }
  func.func @transform_0(%arg0: i32) -> (i32, i32) {
    %c0_i32 = arith.constant 0 : i32
    %c0_i32_0 = arith.constant 0 : i32
    return %arg0, %c0_i32 : i32, i32
  }
  func.func @transform_1(%arg0: i32) -> (i32, i32) {
    %c0_i32 = arith.constant 0 : i32
    %c0_i32_0 = arith.constant 0 : i32
    %c0_i32_1 = arith.constant 0 : i32
    return %c0_i32, %c0_i32_0 : i32, i32
  }
  func.func @transform_2(%arg0: i32) -> (i32, i32) {
    %c0_i32 = arith.constant 0 : i32
    %c0_i32_0 = arith.constant 0 : i32
    %c0_i32_1 = arith.constant 0 : i32
    return %c0_i32, %c0_i32_0 : i32, i32
  }
  func.func @transform_3(%arg0: i32) -> (i32, i32) {
    %c0_i32 = arith.constant 0 : i32
    %c0_i32_0 = arith.constant 0 : i32
    return %arg0, %c0_i32 : i32, i32
  }
  func.func @transform_4(%arg0: i32) -> (i32, i32) {
    %c0_i32 = arith.constant 0 : i32
    %c0_i32_0 = arith.constant 0 : i32
    %c0_i32_1 = arith.constant 0 : i32
    return %c0_i32, %c0_i32_0 : i32, i32
  }
}

</mosaic_0001>

<bundles_post_ra>
// kernel: tpu_custom_call.1
= control target key start
LH: loop header
LB: loop body
LE: loop exit
PB: predicated region body
PF: predicated region fallthrough
CT: control target
= control target key end

     0   :  { %10 = vsyncpa [#allocation3], 0  ;;  %s807_s15 = smov 0   ;;  %s942_s0 = inlined_call_operand.vmem [shape: bf16[128,256], index: 0, kind: input, shape index: {}]   ;;  %s943_s1 = inlined_call_operand.vmem [shape: bf16[256,64], index: 1, kind: input, shape index: {}]   ;;  %s944_s2 = inlined_call_operand.vmem [shape: f32[1,64], index: 2, kind: input, shape index: {}]   ;;  %s945_s3 = inlined_call_operand.vmem [shape: f32[128,64], index: 3, kind: output, shape index: {0}]   ;;  %s946_s4 = inlined_call_operand.hbm [shape: f32[2,64], index: 4, kind: output, shape index: {1}]  }
   0x1 LB: > { %s813_s16 = sadd.s32 4294967295, %s778_s15   ;;  %p607_p0 = scmp.ge.s32.totalorder %s778_s15, 1  ;;  %s778_s15 = sphi %s807_s15, %s16_s15  }
   0x2   : > { %p163_p1 = scmp.lt.s32.totalorder %s778_s15, 3 }
   0x4   : > { %p164_p2 = pnand %p607_p0, %p163_p1 }
   0x5   : > { %s608_s19 = sshll.u32 (!%p164_p2), %s813_s16, 3  ;;  %p638_p4 = scmp.ne.s32.totalorder (!%p164_p2), %s813_s16, 0 }
   0x6   : > { %167 = sbr.rel (%p164_p2) target bundleno = 296 (0x128), region = 32  ;;  %p191_p3 = scmp.lt.s32.totalorder (!%p164_p2), %s608_s19, 15 }
   0xb   : > { %v716_v0 = vld [vmem:[%s943_s1 + $0x78] sm:$0xff]   ;;  %v718_v2 = vld [vmem:[%s943_s1 + $0x70] sm:$0xff]   ;;  %v720_v4 = vld [vmem:[%s943_s1 + $0x68] sm:$0xff]   ;;  %s948_s19 = smov (!%p191_p3, %s608_s19), 15  ;;  %vm452_vm0 = vcmask 523264  }
   0xc   : > { %v717_v1 = vld [vmem:[%s943_s1 + $0x38] sm:$0xff]   ;;  %644 = vmatprep.subr.bf16.mxu0 %v716_v0  ;;  %684 = vmatprep.subr.bf16.mxu1 %v716_v0  ;;  %v719_v3 = vld [vmem:[%s943_s1 + $0x30] sm:$0xff]   ;;  %v721_v5 = vld [vmem:[%s943_s1 + $0x28] sm:$0xff]   ;;  %s643_s8 = sshll.u32 %s948_s19, 3 }
   0xd   : > { %645 = vmatpush3.bf16.msra.mxu0 %v717_v1  ;;  %692 = vmatpush3.bf16.msra.mxu1 %v717_v1  ;;  %v722_v6 = vld [vmem:[%s943_s1 + $0x60] sm:$0xff]   ;;  %v724_v8 = vld [vmem:[%s943_s1 + $0x58] sm:$0xff]   ;;  %s853_s13 = scalar_lea.vmem %s942_s0, %s643_s8  ;;  %v726_v10 = vld [vmem:[%s943_s1 + $0x50] sm:$0xff]   ;;  %s892_s10 = scalar_lea.vmem %s945_s3, %s643_s8 }
   0xe   : > { %646 = vmatprep.subr.bf16.mxu0 %v718_v2  ;;  %685 = vmatprep.subr.bf16.mxu1 %v718_v2  ;;  %v723_v7 = vld [vmem:[%s943_s1 + $0x20] sm:$0xff]   ;;  %v725_v9 = vld [vmem:[%s943_s1 + $0x18] sm:$0xff]   ;;  %v727_v13 = vld [vmem:[%s943_s1 + $0x10] sm:$0xff]  }
   0xf   : > { %v734_v11 = vld [vmem:[%s853_s13 + $0x4] ss:$8 sps:$4 sm:$0xff]   ;;  %v732_v18 = vld [vmem:[%s853_s13] ss:$8 sps:$4 sm:$0xff]   ;;  %v738_v20 = vld [vmem:[%s853_s13 + $0x14] ss:$8 sps:$4 sm:$0xff]  }
  0x10   : > { %v737_v12 = vld [vmem:[%s853_s13 + $0x24] ss:$8 sps:$4 sm:$0xff]   ;;  %419 = vmatprep.mubr.bf16.mxu0 %v734_v11  ;;  %v735_v19 = vld [vmem:[%s853_s13 + $0x20] ss:$8 sps:$4 sm:$0xff]   ;;  %v740_v21 = vld [vmem:[%s853_s13 + $0x34] ss:$8 sps:$4 sm:$0xff]  }
  0x11   : > { %647 = vmatpush3.bf16.msra.mxu0 %v719_v3  ;;  %693 = vmatpush3.bf16.msra.mxu1 %v719_v3  ;;  %v728_v14 = vld [vmem:[%s943_s1 + $0x48] sm:$0xff]   ;;  %v730_v16 = vld [vmem:[%s943_s1 + $0x40] sm:$0xff]   ;;  %v742_v22 = vld [vmem:[%s853_s13 + $0x10] ss:$8 sps:$4 sm:$0xff]  }
  0x12   : > { %648 = vmatprep.subr.bf16.mxu0 %v720_v4  ;;  %686 = vmatprep.subr.bf16.mxu1 %v720_v4  ;;  %v729_v15 = vld [vmem:[%s943_s1 + $0x8] sm:$0xff]   ;;  %v731_v17 = vld [vmem:[%s943_s1] sm:$0xff]   ;;  %v743_v23 = vld [vmem:[%s853_s13 + $0x30] ss:$8 sps:$4 sm:$0xff]  }
  0x13   : > { %435 = vmatprep.mubr.bf16.mxu1 %v737_v12  ;;  %v613_v26 = vld [vmem:[%s944_s2] ss:$0 sm:$0xff] }
  0x15   : > { %649 = vmatpush3.bf16.msra.mxu0 %v721_v5  ;;  %694 = vmatpush3.bf16.msra.mxu1 %v721_v5 }
  0x16   : > { %650 = vmatprep.subr.bf16.mxu0 %v722_v6  ;;  %687 = vmatprep.subr.bf16.mxu1 %v722_v6 }
  0x19   : > { %651 = vmatpush3.bf16.msra.mxu0 %v723_v7  ;;  %695 = vmatpush3.bf16.msra.mxu1 %v723_v7 }
  0x1a   : > { %652 = vmatprep.subr.bf16.mxu0 %v724_v8  ;;  %688 = vmatprep.subr.bf16.mxu1 %v724_v8 }
  0x1d   : > { %653 = vmatpush3.bf16.msra.mxu0 %v725_v9  ;;  %696 = vmatpush3.bf16.msra.mxu1 %v725_v9 }
  0x1e   : > { %654 = vmatprep.subr.bf16.mxu0 %v726_v10  ;;  %689 = vmatprep.subr.bf16.mxu1 %v726_v10 }
  0x21   : > { %655 = vmatpush3.bf16.msra.mxu0 %v727_v13  ;;  %697 = vmatpush3.bf16.msra.mxu1 %v727_v13 }
  0x22   : > { %656 = vmatprep.subr.bf16.mxu0 %v728_v14  ;;  %690 = vmatprep.subr.bf16.mxu1 %v728_v14 }
  0x25   : > { %657 = vmatpush3.bf16.msra.mxu0 %v729_v15  ;;  %698 = vmatpush3.bf16.msra.mxu1 %v729_v15 }
  0x26   : > { %658 = vmatprep.subr.bf16.mxu0 %v730_v16  ;;  %691 = vmatprep.subr.bf16.mxu1 %v730_v16 }
  0x29   : > { %659 = vmatpush3.bf16.msra.mxu0 %v731_v17  ;;  %699 = vmatpush3.bf16.msra.mxu1 %v731_v17 }
  0x2c   : > { %420 = vmatmul.mubr.bf16.vlgmr.msra.gmra.mxu0 %v732_v18  ;;  %436 = vmatmul.mubr.bf16.vlgmr.msra.gmra.mxu1 %v735_v19 }
  0x2d   : > { %427 = vmatprep.mubr.bf16.mxu0 %v738_v20  ;;  %443 = vmatprep.mubr.bf16.mxu1 %v740_v21 }
  0x34   : > { %428 = vmatmul.mubr.bf16.gmra.mxu0 %v742_v22  ;;  %444 = vmatmul.mubr.bf16.gmra.mxu1 %v743_v23 }
  0xec   : > { %v660_v24 = vpop.f32.mrf.mxu0  ;;  %v672_v25 = vpop.f32.mrf.mxu1 }
  0xee   : > { %v661_v27 = vpop.f32.mrf.mxu0  ;;  %v673_v28 = vpop.f32.mrf.mxu1 }
  0xef   : > { %v662_v29 = vadd.f32 %v661_v27, %v660_v24  ;;  %v674_v30 = vadd.f32 %v673_v28, %v672_v25 }
  0xf0   : > { %v663_v31 = vpop.f32.mrf.mxu0  ;;  %v675_v32 = vpop.f32.mrf.mxu1 }
  0xf1   : > { %v422_v33 = vadd.f32 %v662_v29, %v613_v26  ;;  %v438_v34 = vadd.f32 %v674_v30, %v613_v26 }
  0xf2   : > { %v664_v35 = vpop.f32.mrf.mxu0  ;;  %v676_v36 = vpop.f32.mrf.mxu1 }
  0xf3   : > { %453 = vst.msk [vmem:[%s892_s10] sm:$0xff] %vm452_vm0, %v422_v33  ;;  %457 = vst.msk [vmem:[%s892_s10 + $0x20] sm:$0xff] %vm452_vm0, %v438_v34  ;;  %v665_v37 = vadd.f32 %v664_v35, %v663_v31  ;;  %v677_v38 = vadd.f32 %v676_v36, %v675_v32 }
  0xf4   : > { %v666_v39 = vpop.f32.mrf.mxu0  ;;  %v678_v40 = vpop.f32.mrf.mxu1 }
  0xf5   : > { %v425_v41 = vadd.f32 %v665_v37, %v613_v26  ;;  %v441_v42 = vadd.f32 %v677_v38, %v613_v26 }
  0xf6   : > { %v667_v43 = vpop.f32.mrf.mxu0  ;;  %v679_v44 = vpop.f32.mrf.mxu1 }
  0xf7   : > { %454 = vst.msk [vmem:[%s892_s10 + $0x8] sm:$0xff] %vm452_vm0, %v425_v41  ;;  %458 = vst.msk [vmem:[%s892_s10 + $0x28] sm:$0xff] %vm452_vm0, %v441_v42  ;;  %v668_v45 = vadd.f32 %v667_v43, %v666_v39  ;;  %v680_v46 = vadd.f32 %v679_v44, %v678_v40 }
  0xf8   : > { %v669_v47 = vpop.f32.mrf.mxu0  ;;  %v681_v48 = vpop.f32.mrf.mxu1 }
  0xf9   : > { %v430_v49 = vadd.f32 %v668_v45, %v613_v26  ;;  %v446_v50 = vadd.f32 %v680_v46, %v613_v26 }
  0xfa   : > { %v670_v51 = vpop.f32.mrf.mxu0  ;;  %v682_v52 = vpop.f32.mrf.mxu1 }
  0xfb   : > { %455 = vst.msk [vmem:[%s892_s10 + $0x10] sm:$0xff] %vm452_vm0, %v430_v49  ;;  %459 = vst.msk [vmem:[%s892_s10 + $0x30] sm:$0xff] %vm452_vm0, %v446_v50  ;;  %v671_v53 = vadd.f32 %v670_v51, %v669_v47  ;;  %v683_v54 = vadd.f32 %v682_v52, %v681_v48  ;;  %464 = sbr.rel (%p638_p4) target bundleno = 258 (0x102), region = 36 }
  0xfd   : > { %v433_v55 = vadd.f32 %v671_v53, %v613_v26  ;;  %v449_v56 = vadd.f32 %v683_v54, %v613_v26 }
  0xff   : > { %456 = vst.msk [vmem:[%s892_s10 + $0x18] sm:$0xff] %vm452_vm0, %v433_v55  ;;  %460 = vst.msk [vmem:[%s892_s10 + $0x38] sm:$0xff] %vm452_vm0, %v449_v56 }
 0x100   : > { %vm465_vm1 = vcmask 517120   ;;  %v780_v57 = vmov 0.0  }
 0x101   : > { %466 = vst.msk [vmem:[#allocation2] sm:$0x3] %vm465_vm1, %v780_v57 }
 0x102 PF: > { %v467_v58 = vsel %vm452_vm0, %v422_v33, 0.0  ;;  %v468_v59 = vsel %vm452_vm0, %v425_v41, 0.0  ;;  %v470_v60 = vsel %vm452_vm0, %v430_v49, 0.0  ;;  %v472_v62 = vsel %vm452_vm0, %v433_v55, 0.0  ;;  %s781_s19 = smov [#allocation2]   ;;  %p704_p5 = scmp.eq.s32.totalorder %s813_s16, 1 }
 0x103   : > { %v469_v61 = vadd.f32 %v468_v59, %v467_v58  ;;  %v488_v63 = vmul.f32 %v422_v33, %v422_v33  ;;  %v489_v0 = vmul.f32 %v425_v41, %v425_v41  ;;  %v490_v1 = vmul.f32 %v430_v49, %v430_v49  ;;  %s539_s8 = sshll.u32 %s781_s19, 4  ;;  %s540_s8 = int_to_ptr.vmem [resolvable:$true] %s539_s8 }
 0x104   : > { %v491_v3 = vmul.f32 %v433_v55, %v433_v55  ;;  %v474_v4 = vsel %vm452_vm0, %v438_v34, 0.0  ;;  %v492_v5 = vmul.f32 %v438_v34, %v438_v34  ;;  %v476_v11 = vsel %vm452_vm0, %v441_v42, 0.0  ;;  %s744_s11 = scalar_lea.vmem %s540_s8, 32  ;;  %p751_p9 = scmp.lt.s32.totalorder %s540_s8, %s540_s8 }
 0x105   : > { %v471_v2 = vadd.f32 %v470_v60, %v469_v61  ;;  %v496_v6 = vsel %vm452_vm0, %v488_v63, 0.0  ;;  %v497_v7 = vsel %vm452_vm0, %v489_v0, 0.0  ;;  %v499_v10 = vsel %vm452_vm0, %v490_v1, 0.0  ;;  %p745_p6 = scmp.ne.s32.totalorder %s540_s8, %s744_s11  ;;  %p752_p10 = scmp.lt.s32.totalorder %s744_s11, %s744_s11 }
 0x106   : > { %v498_v9 = vadd.f32 %v497_v7, %v496_v6  ;;  %v493_v12 = vmul.f32 %v441_v42, %v441_v42  ;;  %v501_v13 = vsel %vm452_vm0, %v491_v3, 0.0  ;;  %v478_v16 = vsel %vm452_vm0, %v446_v50, 0.0 }
 0x107   : > { %v473_v8 = vadd.f32 %v472_v62, %v471_v2  ;;  %v494_v17 = vmul.f32 %v446_v50, %v446_v50  ;;  %v503_v18 = vsel %vm452_vm0, %v492_v5, 0.0  ;;  %v480_v21 = vsel %vm452_vm0, %v449_v56, 0.0  ;;  %p746_p7 = pnand %p745_p6, %p704_p5  ;;  %p753_p11 = por %p752_p10, %p751_p9 }
 0x108   : > { %v500_v15 = vadd.f32 %v499_v10, %v498_v9  ;;  %v495_v22 = vmul.f32 %v449_v56, %v449_v56  ;;  %v505_v23 = vsel %vm452_vm0, %v493_v12, 0.0  ;;  %vm518_vm2 = vcmask 1040384   ;;  %v517_v44 = vld [vmem:[#allocation2] sm:$0x3] }
 0x109   : > { %v475_v14 = vadd.f32 %v474_v4, %v473_v8  ;;  %v507_v26 = vsel %vm452_vm0, %v494_v17, 0.0  ;;  %vm521_vm3 = vcmask 517120   ;;  %p747_p8 = pneg %p746_p7 }
 0x10a   : > { %v502_v20 = vadd.f32 %v501_v13, %v500_v15  ;;  %v509_v29 = vsel %vm452_vm0, %v495_v22, 0.0 }
 0x10b   : > { %v477_v19 = vadd.f32 %v476_v11, %v475_v14  ;;  %p754_p12 = pnand %p753_p11, %p747_p8 }
 0x10c   : > { %v504_v25 = vadd.f32 %v503_v18, %v502_v20 }
 0x10d   : > { %v479_v24 = vadd.f32 %v478_v16, %v477_v19 }
 0x10e   : > { %v506_v28 = vadd.f32 %v505_v23, %v504_v25 }
 0x10f   : > { %v481_v27 = vadd.f32 %v480_v21, %v479_v24 }
 0x110   : > { %v508_v31 = vadd.f32 %v507_v26, %v506_v28 }
 0x111   : > { %v482_v30 = vrot.slane %v481_v27, 4 }
 0x112   : > { %v510_v33 = vadd.f32 %v509_v29, %v508_v31 }
 0x113   : > { %v483_v32 = vadd.f32 %v482_v30, %v481_v27 }
 0x114   : > { %v511_v35 = vrot.slane %v510_v33, 4 }
 0x115   : > { %v484_v34 = vrot.slane %v483_v32, 2 }
 0x116   : > { %v512_v37 = vadd.f32 %v511_v35, %v510_v33 }
 0x117   : > { %v485_v36 = vadd.f32 %v484_v34, %v483_v32 }
 0x118   : > { %v513_v39 = vrot.slane %v512_v37, 2 }
 0x119   : > { %v486_v38 = vrot.slane %v485_v36, 1 }
 0x11a   : > { %v514_v40 = vadd.f32 %v513_v39, %v512_v37 }
 0x11b   : > { %v487_v41 = vadd.f32 %v486_v38, %v485_v36 }
 0x11c   : > { %v515_v42 = vrot.slane %v514_v40, 1 }
 0x11e   : > { %v516_v43 = vadd.f32 %v515_v42, %v514_v40 }
 0x120   : > { %v519_v45 = vsel %vm518_vm2, %v487_v41, %v516_v43 }
 0x121   : > { %v520_v46 = vadd.f32 %v519_v45, %v517_v44 }
 0x123   : > { %522 = vst.msk [vmem:[#allocation2] sm:$0x3] %vm521_vm3, %v520_v46 }
 0x124   : > { %757 = shalt.err (!%p754_p12)
}
 0x125   : > { %701 = dma.vmem_to_hbm [thread:$0]  (%p704_p5), %s540_s8, 32, %s946_s4, [#allocation3]  }
 0x126   : > { %773 = dma.done.wait (%p704_p5), [#allocation3], 32  }
 0x127   : > { %775 = vsyncadd (%p704_p5), [#allocation3], 4294967264 }
 0x128 PF: > { %s16_s15 = sadd.s32 1, %s778_s15  }
 0x129   : > { %p13_p13 = scmp.ge.s32.totalorder %s16_s15, 4  }
 0x12b   :  { %15 = sbr.rel (!%p13_p13) target bundleno = 1 (0x1), region = 75 }
 0x130   :  { %560 = vsyncpa [#allocation3], 1 }
 0x131   :  { %562 = vsyncpa [#allocation3 + $0x1], 1 }

</bundles_post_ra>
